<compile_context>
chip_gen: v6e
topology: v6e:2x2x1
jax: 0.10.0
libtpu: 0.0.40
codegen_flags: <defaults>
</compile_context>

<pallas_src>
import jax
import jax.numpy as jnp
from jax.experimental import pallas as pl
from jax.experimental.pallas import tpu as pltpu


def fused_policy_sample_kernel(xT_ref, w1T_ref, b1T_ref, w2T_ref, b2T_ref, gT_ref,
                               policyT_ref, act_ref):
    # hidden^T = relu(W1^T @ x^T + b1^T)                         (H, tb)
    hT = jnp.dot(w1T_ref[...], xT_ref[...], preferred_element_type=jnp.float32)
    hT = jnp.maximum(hT + b1T_ref[...], 0.0)

    # logits^T = W2^T @ hidden^T + b2^T                          (A, tb)
    logitsT = jnp.dot(w2T_ref[...], hT, preferred_element_type=jnp.float32)
    logitsT = logitsT + b2T_ref[...]

    # Numerically stable softmax over the action (sublane) axis; exact divide.
    m = jnp.max(logitsT, axis=0, keepdims=True)                  # (1, tb)
    e = jnp.exp(logitsT - m)                                     # (A, tb)
    denom = jnp.sum(e, axis=0, keepdims=True)                    # (1, tb)
    policyT_ref[...] = e / denom

    # Fused Gumbel-max categorical sample == torch.multinomial(policy, 1).
    perturbed = logitsT + gT_ref[...]                            # (A, tb)
    pmax = jnp.max(perturbed, axis=0, keepdims=True)             # (1, tb)
    row = jax.lax.broadcasted_iota(jnp.int32, perturbed.shape, 0)
    # argmax via masked iota-max (ties -> highest index; prob-0 event).
    act_ref[...] = jnp.max(jnp.where(perturbed == pmax, row, -1),
                           axis=0, keepdims=True)


def reinforce_forward(state, params_t, key, *, batch_tile=None):
    """Batched Reinforce.forward.

    Args:
      state:    (B, D) f32 observations.
      params_t: (W1^T (H, D), b1^T (H, 1), W2^T (A, H), b2^T (A, 1)) — prepared
                once, outside the per-step path.
      key:      jax PRNG key for the categorical sample.
      batch_tile: None -> full batch (grid=(1,), right for v5e/v6e);
                  B//2 on v7x to split across the two TensorCores.

    Returns:
      policy  (B, A) f32  == softmax(model(state), dim=-1)
      actions (B,)   i32  == torch.multinomial(policy, 1) per state
    """
    w1T, b1T, w2T, b2T = params_t
    B, D = state.shape
    H = w1T.shape[0]
    A = w2T.shape[0]
    if batch_tile is None:
        batch_tile = B
    assert B % batch_tile == 0

    # Only real data moves: (D, B) transpose is 8 KiB (no zero padding anywhere).
    xT = jnp.transpose(state).astype(jnp.float32)
    # Per-call Gumbel noise for the in-kernel sample (kept host-side so the
    # kernel also lowers in interpret mode; distributionally == multinomial).
    gT = jax.random.gumbel(key, (A, B), dtype=jnp.float32)

    policyT, act_row = pl.pallas_call(
        fused_policy_sample_kernel,
        out_shape=(
            jax.ShapeDtypeStruct((A, B), jnp.float32),
            jax.ShapeDtypeStruct((1, B), jnp.int32),
        ),
        grid=(B // batch_tile,),
        in_specs=[
            pl.BlockSpec((D, batch_tile), lambda i: (0, i)),   # x^T
            pl.BlockSpec((H, D), lambda i: (0, 0)),            # W1^T (full block)
            pl.BlockSpec((H, 1), lambda i: (0, 0)),            # b1^T
            pl.BlockSpec((A, H), lambda i: (0, 0)),            # W2^T
            pl.BlockSpec((A, 1), lambda i: (0, 0)),            # b2^T
            pl.BlockSpec((A, batch_tile), lambda i: (0, i)),   # gumbel noise
        ],
        out_specs=(
            pl.BlockSpec((A, batch_tile), lambda i: (0, i)),   # policy^T (lane-dense)
            pl.BlockSpec((1, batch_tile), lambda i: (0, i)),   # actions  (lane-dense)
        ),
        compiler_params=pltpu.CompilerParams(
            dimension_semantics=("parallel",),                 # shard tiles on v7x
        ),
    )(xT, w1T, b1T, w2T, b2T, gT)

    # (B, A) per-state distribution to match Reinforce._forward (4 KiB transpose;
    # callers that only need the sample can ignore it / consume policyT directly).
    return policyT.T, act_row[0]


if __name__ == "__main__":
    # Small shapes consistent with the module: 128 env states, obs_dim=16,
    # hidden=32, 8 discrete actions.
    B, D_IN, HIDDEN, N_ACTIONS = 128, 16, 32, 8

    root = jax.random.PRNGKey(0)
    k_x, k_w1, k_b1, k_w2, k_b2, k_sample = jax.random.split(root, 6)

    # Deterministic uniform(-1, 1) init, matching Reinforce._init_all.
    w1 = jax.random.uniform(k_w1, (D_IN, HIDDEN), jnp.float32, -1.0, 1.0)
    b1 = jax.random.uniform(k_b1, (HIDDEN,), jnp.float32, -1.0, 1.0)
    w2 = jax.random.uniform(k_w2, (HIDDEN, N_ACTIONS), jnp.float32, -1.0, 1.0)
    b2 = jax.random.uniform(k_b2, (N_ACTIONS,), jnp.float32, -1.0, 1.0)
    state = jax.random.uniform(k_x, (B, D_IN), jnp.float32, -1.0, 1.0)

    # One-time transposed parameter prep (outside the per-step forward path).
    params_t = (
        w1.T,                          # (H, D)
        b1.reshape(HIDDEN, 1),         # (H, 1)
        w2.T,                          # (A, H)
        b2.reshape(N_ACTIONS, 1),      # (A, 1)
    )

    policy, actions = reinforce_forward(state, params_t, k_sample)
    policy = jax.block_until_ready(policy)
    actions = jax.block_until_ready(actions)

    # Pure-JAX reference: policy = softmax(model(state), dim=-1).
    logits_ref = jnp.maximum(state @ w1 + b1, 0.0) @ w2 + b2
    policy_ref = jax.nn.softmax(logits_ref, axis=-1)
    assert policy.shape == (B, N_ACTIONS)
    assert jnp.allclose(jnp.sum(policy, axis=-1), 1.0, atol=1e-5)
    assert jnp.allclose(policy, policy_ref, atol=1e-4, rtol=1e-4)

    # The fused Gumbel-max sample must pick the per-state max of logits + noise
    # (same key/noise the wrapper drew), i.e. a valid multinomial draw.
    g_ref = jax.random.gumbel(k_sample, (N_ACTIONS, B), dtype=jnp.float32)
    perturbed_ref = logits_ref.T + g_ref                       # (A, B)
    assert actions.shape == (B,)
    assert int(actions.min()) >= 0 and int(actions.max()) < N_ACTIONS
    chosen = jnp.take_along_axis(perturbed_ref, actions[None, :], axis=0)[0]
    assert jnp.allclose(chosen, jnp.max(perturbed_ref, axis=0), atol=1e-4)
    _ = int(actions[0])  # mirrors output.item() for a single env state

    print("KERNEL_OK")
</pallas_src>

<mosaic_0001>
module attributes {stable_mosaic.version = 11 : i64} {
  func.func @fused_policy_sample_kernel(%arg0: i32, %arg1: memref<16x128xf32, #tpu.memory_space<vmem>>, %arg2: memref<32x16xf32, #tpu.memory_space<vmem>>, %arg3: memref<32x1xf32, #tpu.memory_space<vmem>>, %arg4: memref<8x32xf32, #tpu.memory_space<vmem>>, %arg5: memref<8x1xf32, #tpu.memory_space<vmem>>, %arg6: memref<8x128xf32, #tpu.memory_space<vmem>>, %arg7: memref<8x128xf32, #tpu.memory_space<vmem>>, %arg8: memref<1x128xi32, #tpu.memory_space<vmem>>) attributes {dimension_semantics = [#tpu.dimension_semantics<parallel>], iteration_bounds = array<i64: 1>, scalar_prefetch = 0 : i64, scratch_operands = 0 : i64, tpu.core_type = #tpu.core_type<tc>, window_params = [{transform_indices = @transform_0, window_bounds = array<i64: 16, 128>}, {pipeline_mode = #tpu.pipeline_mode<synchronous>, transform_indices = @transform_1, window_bounds = array<i64: 32, 16>}, {pipeline_mode = #tpu.pipeline_mode<synchronous>, transform_indices = @transform_2, window_bounds = array<i64: 32, 1>}, {pipeline_mode = #tpu.pipeline_mode<synchronous>, transform_indices = @transform_3, window_bounds = array<i64: 8, 32>}, {pipeline_mode = #tpu.pipeline_mode<synchronous>, transform_indices = @transform_4, window_bounds = array<i64: 8, 1>}, {transform_indices = @transform_5, window_bounds = array<i64: 8, 128>}, {transform_indices = @transform_6, window_bounds = array<i64: 8, 128>}, {transform_indices = @transform_7, window_bounds = array<i64: 1, 128>}]} {
    %c0 = arith.constant 0 : index
    %c0_0 = arith.constant 0 : index
    %0 = vector.load %arg2[%c0, %c0_0] : memref<32x16xf32, #tpu.memory_space<vmem>>, vector<32x16xf32>
    %c0_1 = arith.constant 0 : index
    %c0_2 = arith.constant 0 : index
    %1 = vector.load %arg1[%c0_1, %c0_2] : memref<16x128xf32, #tpu.memory_space<vmem>>, vector<16x128xf32>
    %cst = arith.constant dense<0.000000e+00> : vector<32x128xf32>
    %2 = tpu.matmul %0, %1, %cst {dimension_numbers = #tpu.dot_dimension_numbers<[1], [0], [0], [1], [0, 0, 1, 1], [], []>} : vector<32x16xf32>, vector<16x128xf32>, vector<32x128xf32> -> vector<32x128xf32>
    %c0_3 = arith.constant 0 : index
    %c0_4 = arith.constant 0 : index
    %3 = vector.load %arg3[%c0_3, %c0_4] : memref<32x1xf32, #tpu.memory_space<vmem>>, vector<32x1xf32>
    %4 = vector.broadcast %3 : vector<32x1xf32> to vector<32x128xf32>
    %5 = arith.addf %2, %4 : vector<32x128xf32>
    %cst_5 = arith.constant 0.000000e+00 : f32
    %6 = vector.broadcast %cst_5 : f32 to vector<32x128xf32>
    %7 = arith.maximumf %5, %6 : vector<32x128xf32>
    %c0_6 = arith.constant 0 : index
    %c0_7 = arith.constant 0 : index
    %8 = vector.load %arg4[%c0_6, %c0_7] : memref<8x32xf32, #tpu.memory_space<vmem>>, vector<8x32xf32>
    %cst_8 = arith.constant dense<0.000000e+00> : vector<8x128xf32>
    %9 = tpu.matmul %8, %7, %cst_8 {dimension_numbers = #tpu.dot_dimension_numbers<[1], [0], [0], [1], [0, 0, 1, 1], [], []>} : vector<8x32xf32>, vector<32x128xf32>, vector<8x128xf32> -> vector<8x128xf32>
    %c0_9 = arith.constant 0 : index
    %c0_10 = arith.constant 0 : index
    %10 = vector.load %arg5[%c0_9, %c0_10] : memref<8x1xf32, #tpu.memory_space<vmem>>, vector<8x1xf32>
    %11 = vector.broadcast %10 : vector<8x1xf32> to vector<8x128xf32>
    %12 = arith.addf %9, %11 : vector<8x128xf32>
    %cst_11 = arith.constant dense<0xFF800000> : vector<128xf32>
    %13 = vector.multi_reduction <maximumf>, %12, %cst_11 [0] : vector<8x128xf32> to vector<128xf32>
    %14 = vector.shape_cast %13 : vector<128xf32> to vector<1x128xf32>
    %15 = vector.broadcast %14 : vector<1x128xf32> to vector<8x128xf32>
    %16 = arith.subf %12, %15 : vector<8x128xf32>
    %17 = math.exp %16 : vector<8x128xf32>
    %cst_12 = arith.constant dense<0.000000e+00> : vector<128xf32>
    %18 = vector.multi_reduction <add>, %17, %cst_12 [0] : vector<8x128xf32> to vector<128xf32>
    %19 = vector.shape_cast %18 : vector<128xf32> to vector<1x128xf32>
    %20 = vector.broadcast %19 : vector<1x128xf32> to vector<8x128xf32>
    %21 = arith.divf %17, %20 : vector<8x128xf32>
    %c0_13 = arith.constant 0 : index
    %c0_14 = arith.constant 0 : index
    %22 = vector.load %arg7[%c0_13, %c0_14] : memref<8x128xf32, #tpu.memory_space<vmem>>, vector<8x128xf32>
    tpu.vector_store %arg7[%c0_13, %c0_14], %21 {strides = array<i32>} : memref<8x128xf32, #tpu.memory_space<vmem>>, vector<8x128xf32>,
    %c0_15 = arith.constant 0 : index
    %c0_16 = arith.constant 0 : index
    %23 = vector.load %arg6[%c0_15, %c0_16] : memref<8x128xf32, #tpu.memory_space<vmem>>, vector<8x128xf32>
    %24 = arith.addf %12, %23 : vector<8x128xf32>
    %cst_17 = arith.constant dense<0xFF800000> : vector<128xf32>
    %25 = vector.multi_reduction <maximumf>, %24, %cst_17 [0] : vector<8x128xf32> to vector<128xf32>
    %26 = vector.shape_cast %25 : vector<128xf32> to vector<1x128xf32>
    %27 = tpu.iota {dimensions = array<i32: 0>} : vector<8x128xi32>
    %28 = vector.broadcast %26 : vector<1x128xf32> to vector<8x128xf32>
    %29 = arith.cmpf oeq, %24, %28 : vector<8x128xf32>
    %c-1_i32 = arith.constant -1 : i32
    %30 = vector.broadcast %c-1_i32 : i32 to vector<8x128xi32>
    %31 = arith.select %29, %27, %30 : vector<8x128xi1>, vector<8x128xi32>
    %cst_18 = arith.constant dense<-2147483648> : vector<128xi32>
    %32 = vector.multi_reduction <maxsi>, %31, %cst_18 [0] : vector<8x128xi32> to vector<128xi32>
    %33 = vector.shape_cast %32 : vector<128xi32> to vector<1x128xi32>
    %c0_19 = arith.constant 0 : index
    %c0_20 = arith.constant 0 : index
    %34 = vector.load %arg8[%c0_19, %c0_20] : memref<1x128xi32, #tpu.memory_space<vmem>>, vector<1x128xi32>
    tpu.vector_store %arg8[%c0_19, %c0_20], %33 {strides = array<i32>} : memref<1x128xi32, #tpu.memory_space<vmem>>, vector<1x128xi32>,
    return
  }
  func.func @transform_0(%arg0: i32) -> (i32, i32) {
    %c0_i32 = arith.constant 0 : i32
    %c0_i32_0 = arith.constant 0 : i32
    return %c0_i32, %arg0 : i32, i32
  }
  func.func @transform_1(%arg0: i32) -> (i32, i32) {
    %c0_i32 = arith.constant 0 : i32
    %c0_i32_0 = arith.constant 0 : i32
    %c0_i32_1 = arith.constant 0 : i32
    return %c0_i32, %c0_i32_0 : i32, i32
  }
  func.func @transform_2(%arg0: i32) -> (i32, i32) {
    %c0_i32 = arith.constant 0 : i32
    %c0_i32_0 = arith.constant 0 : i32
    %c0_i32_1 = arith.constant 0 : i32
    return %c0_i32, %c0_i32_0 : i32, i32
  }
  func.func @transform_3(%arg0: i32) -> (i32, i32) {
    %c0_i32 = arith.constant 0 : i32
    %c0_i32_0 = arith.constant 0 : i32
    %c0_i32_1 = arith.constant 0 : i32
    return %c0_i32, %c0_i32_0 : i32, i32
  }
  func.func @transform_4(%arg0: i32) -> (i32, i32) {
    %c0_i32 = arith.constant 0 : i32
    %c0_i32_0 = arith.constant 0 : i32
    %c0_i32_1 = arith.constant 0 : i32
    return %c0_i32, %c0_i32_0 : i32, i32
  }
  func.func @transform_5(%arg0: i32) -> (i32, i32) {
    %c0_i32 = arith.constant 0 : i32
    %c0_i32_0 = arith.constant 0 : i32
    return %c0_i32, %arg0 : i32, i32
  }
  func.func @transform_6(%arg0: i32) -> (i32, i32) {
    %c0_i32 = arith.constant 0 : i32
    %c0_i32_0 = arith.constant 0 : i32
    return %c0_i32, %arg0 : i32, i32
  }
  func.func @transform_7(%arg0: i32) -> (i32, i32) {
    %c0_i32 = arith.constant 0 : i32
    %c0_i32_0 = arith.constant 0 : i32
    return %c0_i32, %arg0 : i32, i32
  }
}

</mosaic_0001>

<bundles_post_ra>
// kernel: tpu_custom_call.1
= control target key start
LH: loop header
LB: loop body
LE: loop exit
PB: predicated region body
PF: predicated region fallthrough
CT: control target
= control target key end

     0   :  { %13 = vsyncpa [#allocation3], 0  ;;  %vm57_vm0 = vcmask 130048   ;;  %v400_v4 = vmov 0   ;;  %s494_s0 = inlined_call_operand.vmem [shape: f32[16,128], index: 0, kind: input, shape index: {}]   ;;  %s495_s1 = inlined_call_operand.vmem [shape: f32[32,16], index: 1, kind: input, shape index: {}]   ;;  %s496_s2 = inlined_call_operand.vmem [shape: f32[32,1], index: 2, kind: input, shape index: {}]   ;;  %s497_s3 = inlined_call_operand.vmem [shape: f32[8,32], index: 3, kind: input, shape index: {}]   ;;  %s498_s4 = inlined_call_operand.vmem [shape: f32[8,1], index: 4, kind: input, shape index: {}]   ;;  %s499_s5 = inlined_call_operand.vmem [shape: f32[8,128], index: 5, kind: input, shape index: {}]   ;;  %s500_s6 = inlined_call_operand.hbm [shape: f32[8,128], index: 6, kind: output, shape index: {0}]   ;;  %s501_s7 = inlined_call_operand.hbm [shape: s32[1,128], index: 7, kind: output, shape index: {1}]  }
   0x1   :  { %v32_v0 = vld [vmem:[%s494_s0 + $0x8] sm:$0xff]  ;;  %v31_v1 = vld [vmem:[%s494_s0] sm:$0xff]  ;;  %350 = vset.pattern.permute.xlu0 %v400_v4  ;;  %v36_v5 = vld [vmem:[%s496_s2 + $0x18] sm:$0xff] }
   0x2   :  { %v27_v2 = vld [vmem:[%s495_s1] sm:$0xff]  ;;  %324 = vmatprep.subr.mxu0 %v32_v0  ;;  %v28_v3 = vld [vmem:[%s495_s1 + $0x8] sm:$0xff]  ;;  %v29_v7 = vld [vmem:[%s495_s1 + $0x10] sm:$0xff]  ;;  %54 = vperm.xlu0 %350, %v36_v5  }
   0x3   :  { %328 = vmatprep.mubr.msk.f32.mxu0 %vm57_vm0, %v27_v2  ;;  %325 = vmatpush3.msra.mxu0 %v32_v0  ;;  %v34_v6 = vld [vmem:[%s496_s2 + $0x8] sm:$0xff] }
   0x4   :  { %326 = vmatprep.subr.mxu0 %v31_v1 }
   0x5   :  { %14 = vsyncpa [#allocation5], 0  ;;  %327 = vmatpush3.msra.mxu0 %v31_v1  ;;  %351 = vset.pattern.permute.xlu1 %v400_v4  ;;  %v35_v8 = vld [vmem:[%s496_s2 + $0x10] sm:$0xff]  ;;  %v30_v9 = vld [vmem:[%s495_s1 + $0x18] sm:$0xff]  ;;  %v401_v12 = vmov 0.0   ;;  %vm402_vm1 = vmmov 0   ;;  %v266_v43 = vlaneseq }
   0x6   :  { %329 = vmatmul.mubr.msk.f32.vlgmr.msra.gmra.mxu0 %vm57_vm0, %v28_v3  ;;  %44 = vperm.xlu1 %351, %v34_v6   ;;  %v33_v10 = vld [vmem:[%s496_s2] sm:$0xff]  ;;  %vm166_vm2 = vcmask 261120  }
   0x7   :  { %331 = vmatprep.mubr.msk.f32.mxu0 %vm57_vm0, %v29_v7  ;;  %49 = vperm.xlu0 %350, %v35_v8   ;;  %v160_v11 = vld [vmem:[%s498_s4] sm:$0xff]  ;;  %v267_v48 = vshrl.u32 %v266_v43, 7 }
   0x8   :  { %334 = vmatprep.subr.mxu1 %v401_v12  ;;  %342 = vmatprep.mubr.msk.f32.mxu1 %vm402_vm1, %v401_v12  ;;  %v159_v29 = vld [vmem:[%s497_s3] sm:$0xff]  ;;  %s403_s3 = smov [#allocation4]  }
   0x9   :  { %v258_v32 = vld [vmem:[%s499_s5] sm:$0xff]  ;;  %s296_s5 = sshll.u32 %s403_s3, 4  ;;  %s297_s5 = int_to_ptr.vmem [resolvable:$true] %s296_s5 }
   0xa   :  { %332 = vmatmul.mubr.msk.f32.gmra.mxu0 %vm57_vm0, %v30_v9  ;;  %39 = vperm.xlu1 %351, %v33_v10   ;;  %s356_s23 = scalar_lea.vmem %s297_s5, 16  ;;  %s360_s24 = scalar_lea.vmem %s297_s5, 32 }
   0xb   :  { %163 = vperm.xlu0 %350, %v160_v11   ;;  %p357_p0 = scmp.ne.s32.totalorder %s297_s5, %s356_s23  ;;  %p361_p1 = scmp.lt.s32.totalorder %s297_s5, %s297_s5 }
   0xc   :  { %p362_p2 = scmp.lt.s32.totalorder %s360_s24, %s356_s23 }
   0xe   :  { %p363_p3 = por %p362_p2, %p361_p1 }
  0x10   :  { %p364_p4 = pnand %p363_p3, %p357_p0 }
  0x7d   :  { %v55_v13 = vpop.permute.xlu0 %54 }
  0x81   :  { %v45_v14 = vpop.permute.xlu1 %44 }
  0x82   :  { %v50_v18 = vpop.permute.xlu0 %49 }
  0x85   :  { %v40_v20 = vpop.permute.xlu1 %39 }
  0x86   :  { %v164_v30 = vpop.permute.xlu0 %163 }
  0xc6   :  { %v330_v15 = vpop.f32.mrf.mxu0 }
  0xc7   :  { %v142_v22 = vadd.f32 %v330_v15, %v45_v14 }
  0xc8   :  { %v136_v16 = vpop.f32.mrf.mxu0 }
  0xc9   :  { %v137_v25 = vadd.f32 %v136_v16, %v40_v20  ;;  %v156_v27 = vmax.f32 %v142_v22, 0.0 }
  0xca   :  { %v333_v17 = vpop.f32.mrf.mxu0 }
  0xcb   :  { %v152_v19 = vadd.f32 %v333_v17, %v55_v13  ;;  %v155_v28 = vmax.f32 %v137_v25, 0.0 }
  0xcc   :  { %v146_v21 = vpop.f32.mrf.mxu0 }
  0xcd   :  { %v158_v23 = vmax.f32 %v152_v19, 0.0  ;;  %v147_v24 = vadd.f32 %v146_v21, %v50_v18 }
  0xcf   :  { %v157_v26 = vmax.f32 %v147_v24, 0.0  ;;  %335 = vmatpush3.msra.mxu1 %v158_v23 }
  0xd0   :  { %336 = vmatprep.subr.mxu1 %v401_v12 }
  0xd1   :  { %337 = vmatpush3.msra.mxu1 %v157_v26 }
  0xd2   :  { %338 = vmatprep.subr.mxu1 %v401_v12 }
  0xd3   :  { %339 = vmatpush3.msra.mxu1 %v156_v27 }
  0xd4   :  { %340 = vmatprep.subr.mxu1 %v401_v12 }
  0xd5   :  { %341 = vmatpush3.msra.mxu1 %v155_v28 }
  0xd6   :  { %343 = vmatmul.mubr.msk.f32.vlgmr.msra.gmra.mxu1 %vm166_vm2, %v159_v29 }
 0x196   :  { %v236_v31 = vpop.f32.mrf.mxu1 }
 0x197   :  { %v237_v33 = vadd.f32 %v236_v31, %v164_v30 }
 0x198   :  { %v344_v34 = vpop.f32.mrf.mxu1 }
 0x199   :  { %v240_v35 = vrot.slane %v237_v33, 4  ;;  %v259_v36 = vadd.f32 %v258_v32, %v237_v33 }
 0x19b   :  { %v241_v37 = vmax.f32 %v237_v33, %v240_v35  ;;  %v260_v38 = vrot.slane %v259_v36, 4 }
 0x19d   :  { %v242_v39 = vrot.slane %v241_v37, 2  ;;  %v261_v40 = vmax.f32 %v259_v36, %v260_v38 }
 0x19f   :  { %v243_v41 = vmax.f32 %v241_v37, %v242_v39  ;;  %v262_v42 = vrot.slane %v261_v40, 2 }
 0x1a1   :  { %v244_v44 = vrot.slane %v243_v41, 1  ;;  %v263_v45 = vmax.f32 %v261_v40, %v262_v42 }
 0x1a3   :  { %v245_v46 = vmax.f32 %v243_v41, %v244_v44  ;;  %v264_v47 = vrot.slane %v263_v45, 1 }
 0x1a5   :  { %v246_v49 = vsub.f32 %v237_v33, %v245_v46  ;;  %v265_v50 = vmax.f32 %v263_v45, %v264_v47 }
 0x1a7   :  { %v247_v51 = vmul.f32 1.442695, %v246_v49  ;;  %vm268_vm3 = vcmp.eq.f32.partialorder %v259_v36, %v265_v50 }
 0x1a8   :  { %v269_v52 = vsel %vm268_vm3, %v267_v48, 4294967295 }
 0x1a9   :  { %352 = vpow2.f32 %v247_v51  ;;  %v270_v53 = vrot.slane %v269_v52, 4 }
 0x1ab   :  { %vm271_vm4 = vcmp.gt.s32.totalorder %v269_v52, %v270_v53 }
 0x1ac   :  { %v272_v54 = vsel %vm271_vm4, %v269_v52, %v270_v53 }
 0x1ad   :  { %v273_v55 = vrot.slane %v272_v54, 2 }
 0x1af   :  { %vm274_vm5 = vcmp.gt.s32.totalorder %v272_v54, %v273_v55 }
 0x1b0   :  { %v275_v56 = vsel %vm274_vm5, %v272_v54, %v273_v55 }
 0x1b1   :  { %v276_v57 = vrot.slane %v275_v56, 1 }
 0x1b3   :  { %vm277_vm6 = vcmp.gt.s32.totalorder %v275_v56, %v276_v57 }
 0x1b4   :  { %v278_v58 = vsel %vm277_vm6, %v275_v56, %v276_v57 }
 0x1b5   :  { %279 = vst [vmem:[#allocation4] sm:$0x1] %v278_v58 }
 0x1b6   :  { %v353_v59 = vpop.eup %352 }
 0x1b7   :  { %367 = shalt.err (!%p364_p4)
}
 0x1b8   :  { %299 = dma.vmem_to_hbm [thread:$0]  %s297_s5, 16, %s501_s7, [#allocation5]   ;;  %v249_v60 = vrot.slane %v353_v59, 4 }
 0x1b9   :  { %s404_s27 = smov [#allocation2]  }
 0x1ba   :  { %v250_v61 = vadd.f32 %v353_v59, %v249_v60  ;;  %s286_s28 = sshll.u32 %s404_s27, 4  ;;  %s287_s28 = int_to_ptr.vmem [resolvable:$true] %s286_s28 }
 0x1bb   :  { %s376_s29 = scalar_lea.vmem %s287_s28, 128  ;;  %p381_p6 = scmp.lt.s32.totalorder %s287_s28, %s287_s28 }
 0x1bc   :  { %v251_v62 = vrot.slane %v250_v61, 2  ;;  %p377_p5 = scmp.ne.s32.totalorder %s287_s28, %s376_s29  ;;  %p382_p7 = scmp.lt.s32.totalorder %s376_s29, %s376_s29 }
 0x1be   :  { %v252_v63 = vadd.f32 %v251_v62, %v250_v61  ;;  %p383_p8 = por %p382_p7, %p381_p6 }
 0x1c0   :  { %v253_v0 = vrot.slane %v252_v63, 1  ;;  %p384_p9 = pnand %p383_p8, %p377_p5 }
 0x1c2   :  { %v254_v1 = vadd.f32 %v253_v0, %v252_v63 }
 0x1c4   :  { %354 = vrcp.f32 %v254_v1 }
 0x1d1   :  { %v355_v2 = vpop.eup %354 }
 0x1d2   :  { %v256_v3 = vmul.f32 %v355_v2, %v353_v59 }
 0x1d4   :  { %257 = vst [vmem:[#allocation2] sm:$0xff] %v256_v3 }
 0x1d5   :  { %387 = shalt.err (!%p384_p9)
}
 0x1d6   :  { %289 = dma.vmem_to_hbm [thread:$0]  %s287_s28, 128, %s500_s6, [#allocation3]  }
 0x1d7   :  { %396 = dma.done.wait [#allocation3], 128  }
 0x1d8   :  { %397 = vsyncadd [#allocation3], 4294967168 }
 0x1d9   :  { %398 = dma.done.wait [#allocation5], 16  }
 0x1da   :  { %399 = vsyncadd [#allocation5], 4294967280 }
 0x1db   :  { %306 = vsyncpa [#allocation3], 1 }
 0x1dc   :  { %307 = vsyncpa [#allocation5], 1 }

</bundles_post_ra>
